<compile_context>
chip_gen: v7x
topology: tpu7x:2x2x1
jax: 0.10.0
libtpu: 0.0.40
codegen_flags: <defaults>
</compile_context>

<pallas_src>
import jax
import jax.numpy as jnp
from jax.experimental import pallas as pl
from jax.experimental.pallas import tpu as pltpu

LANES = 128
_MIB = 1024 * 1024


def _copy_kernel(x_ref, o_ref):
    # Identity copy of one (block_rows, 128) tile: the entire data movement
    # implied by a forced .contiguous() materialization.
    o_ref[...] = x_ref[...]


def _resolve_shape(shape, total):
    """Resolve a single -1 entry like torch.view does."""
    shape = tuple(int(s) for s in shape)
    if -1 in shape:
        idx = shape.index(-1)
        known = 1
        for i, s in enumerate(shape):
            if i != idx:
                known *= s
        assert known > 0 and total % known == 0, "view shape incompatible with input size"
        shape = shape[:idx] + (total // known,) + shape[idx + 1:]
    prod = 1
    for s in shape:
        prod *= s
    assert prod == total, "view shape incompatible with input size"
    return shape


def _vmem_capacity_bytes():
    # Derive block sizing from the actual chip (v7x has only 64 MiB per TC).
    try:
        return int(pltpu.get_tpu_info().vmem_capacity_bytes)
    except Exception:
        return 64 * _MIB  # conservative fallback (v7x per-TensorCore budget)


def _pallas_contiguous_copy(x):
    """Materialize a contiguous copy of x's flat buffer with a tiled Pallas copy."""
    total = int(x.size)
    itemsize = jnp.dtype(x.dtype).itemsize
    # dtype-aware native sublane tile: f32 -> 8, bf16 -> 16, int8/fp8 -> 32.
    sub = 8 * max(1, 4 // itemsize)

    # Lane-dense, (sub,128)-aligned layout: pad the flat buffer instead of
    # emitting a single giant un-tiled (1, N) block with masked partial stores.
    flat = x.reshape(-1)
    align = sub * LANES
    padded_total = ((total + align - 1) // align) * align
    if padded_total != total:
        flat = jnp.pad(flat, (0, padded_total - total))
    rows = padded_total // LANES
    flat2d = flat.reshape(rows, LANES)

    # Block sizing: mem-bound copy wants multi-MiB blocks to amortize the
    # ~0.35 us per-grid-step overhead.  in+out, double-buffered => 4x block
    # bytes of VMEM; keep that comfortably under the per-core VMEM capacity.
    vmem_cap = _vmem_capacity_bytes()
    block_bytes_target = max(1 * _MIB, min(8 * _MIB, vmem_cap // 8))
    row_bytes = LANES * itemsize
    target_rows = max(sub, (block_bytes_target // row_bytes) // sub * sub)
    block_rows = min(target_rows, rows)  # rows is a multiple of sub (padded)
    grid = (pl.cdiv(rows, block_rows),)  # ragged tail (if any) is masked by Pallas

    block_bytes = block_rows * row_bytes
    vmem_limit = int(min(vmem_cap * 3 // 4, 4 * block_bytes + 16 * _MIB))

    # Note: input_output_aliases={0: 0} could drop the second full-size HBM
    # buffer, but at this eager API boundary the input is not donatable, so
    # XLA would insert a defensive copy (extra traffic); intentionally omitted.
    out2d = pl.pallas_call(
        _copy_kernel,
        out_shape=jax.ShapeDtypeStruct((rows, LANES), x.dtype),
        grid_spec=pltpu.PrefetchScalarGridSpec(
            num_scalar_prefetch=0,
            grid=grid,
            in_specs=[pl.BlockSpec((block_rows, LANES), lambda i: (i, 0))],
            out_specs=pl.BlockSpec((block_rows, LANES), lambda i: (i, 0)),
        ),
        compiler_params=pltpu.CompilerParams(
            dimension_semantics=("parallel",),   # lets v7x split the grid over both TCs
            vmem_limit_bytes=vmem_limit,
        ),
    )(flat2d)

    out_flat = out2d.reshape(-1)
    if padded_total != total:
        out_flat = out_flat[:total]
    return out_flat


def pallas_view(x, shape, contiguous: bool = False, force_copy: bool = False):
    """Equivalent of View(shape, contiguous)(x).

    Default path: torch.view on a contiguous buffer moves no data, so return a
    metadata-only jnp.reshape.  Set force_copy=True to materialize a fresh
    contiguous buffer through the Pallas tiled copy kernel.
    """
    total = int(x.size)
    out_shape = _resolve_shape(shape, total)
    if not force_copy:
        return jnp.reshape(x, out_shape)
    return _pallas_contiguous_copy(x).reshape(out_shape)


class ViewPallas:
    """Mirror of the PyTorch `View` module."""

    def __init__(self, shape: tuple, contiguous: bool = False, force_copy: bool = False):
        self.shape = shape
        self.contiguous = contiguous  # JAX arrays are already contiguous
        self.force_copy = force_copy

    def __call__(self, x):
        return pallas_view(x, self.shape, self.contiguous, self.force_copy)


if __name__ == "__main__":
    key = jax.random.PRNGKey(0)
    # Small NCHW-like input consistent with typical ASR usage of View.
    x = jax.random.normal(key, (2, 4, 16, 16), dtype=jnp.float32)
    ref = x.reshape(2, 4, -1)

    # 1) Default path: metadata-only reshape (matches torch.view exactly).
    view = ViewPallas(shape=(2, 4, -1), contiguous=True)
    y = jax.block_until_ready(view(x))
    assert y.shape == ref.shape and y.dtype == ref.dtype
    assert bool(jnp.array_equal(y, ref))

    # 2) Forced-copy path: exercises the Pallas tiled identity copy on TPU.
    view_copy = ViewPallas(shape=(2, 4, -1), contiguous=True, force_copy=True)
    y2 = jax.block_until_ready(view_copy(x))
    assert y2.shape == ref.shape and y2.dtype == ref.dtype
    assert bool(jnp.array_equal(y2, ref))

    # 3) Non-128-divisible bf16 input: exercises padded, dtype-aware tiling.
    xb = jax.random.normal(jax.random.PRNGKey(0), (2, 3, 5, 7), dtype=jnp.bfloat16)
    refb = xb.reshape(6, -1)
    yb = jax.block_until_ready(pallas_view(xb, (6, -1), contiguous=True, force_copy=True))
    assert yb.shape == refb.shape and yb.dtype == refb.dtype
    assert bool(jnp.array_equal(yb, refb))

    print("KERNEL_OK")
</pallas_src>

<mosaic_0001>
module attributes {stable_mosaic.version = 11 : i64} {
  func.func @_copy_kernel(%arg0: i32, %arg1: memref<16x128xf32, #tpu.memory_space<vmem>>, %arg2: memref<16x128xf32, #tpu.memory_space<vmem>>) attributes {dimension_semantics = [#tpu.dimension_semantics<parallel>], iteration_bounds = array<i64: 1>, scalar_prefetch = 0 : i64, scratch_operands = 0 : i64, tpu.core_type = #tpu.core_type<tc>, window_params = [{transform_indices = @transform_0, window_bounds = array<i64: 16, 128>}, {transform_indices = @transform_1, window_bounds = array<i64: 16, 128>}]} {
    %c0 = arith.constant 0 : index
    %c0_0 = arith.constant 0 : index
    %0 = vector.load %arg1[%c0, %c0_0] : memref<16x128xf32, #tpu.memory_space<vmem>>, vector<16x128xf32>
    %c0_1 = arith.constant 0 : index
    %c0_2 = arith.constant 0 : index
    %1 = vector.load %arg2[%c0_1, %c0_2] : memref<16x128xf32, #tpu.memory_space<vmem>>, vector<16x128xf32>
    tpu.vector_store %arg2[%c0_1, %c0_2], %0 {strides = array<i32>} : memref<16x128xf32, #tpu.memory_space<vmem>>, vector<16x128xf32>,
    return
  }
  func.func @transform_0(%arg0: i32) -> (i32, i32) {
    %c0_i32 = arith.constant 0 : i32
    %c0_i32_0 = arith.constant 0 : i32
    return %arg0, %c0_i32 : i32, i32
  }
  func.func @transform_1(%arg0: i32) -> (i32, i32) {
    %c0_i32 = arith.constant 0 : i32
    %c0_i32_0 = arith.constant 0 : i32
    return %arg0, %c0_i32 : i32, i32
  }
}

</mosaic_0001>

<bundles_post_ra>
// kernel: tpu_custom_call.1
= control target key start
LH: loop header
LB: loop body
LE: loop exit
PB: predicated region body
PF: predicated region fallthrough
CT: control target
= control target key end

     0   :  { %6 = vsyncpa [#allocation3], 0  ;;  %s134_s0 = inlined_call_operand.hbm [shape: f32[16,128], index: 0, kind: input, shape index: {}]   ;;  %s135_s1 = inlined_call_operand.hbm [shape: f32[16,128], index: 1, kind: output, shape index: {}]  }
   0x1   :  { %7 = vsyncpa [#allocation4], 0  ;;  %s96_s6 = smov [#allocation2]   ;;  %s48_s10 = scalar_lea.hbm %s134_s0, 256 }
   0x2   :  { %s13_s7 = sshll.u32 %s96_s6, 4  ;;  %p49_p0 = scmp.ne.s32.totalorder %s134_s0, %s48_s10  ;;  %s14_s7 = int_to_ptr.vmem [resolvable:$true] %s13_s7 }
   0x3   :  { %p52_p1 = scmp.lt.u32.totalorder %s48_s10, %s134_s0 }
   0x5   :  { %p54_p2 = pnand %p52_p1, %p49_p0 }
   0x7   :  { %57 = shalt.err (!%p54_p2)
}
   0x8   :  { %s58_s15 = scalar_lea.vmem %s14_s7, 256  ;;  %p63_p4 = scmp.lt.s32.totalorder %s14_s7, %s14_s7 }
   0x9   :  { %p59_p3 = scmp.ne.s32.totalorder %s14_s7, %s58_s15  ;;  %p64_p5 = scmp.lt.s32.totalorder %s58_s15, %s58_s15 }
   0xb   :  { %p65_p6 = por %p64_p5, %p63_p4 }
   0xd   :  { %p66_p7 = pnand %p65_p6, %p59_p3 }
   0xf   :  { %69 = shalt.err (!%p66_p7)
}
  0x10   :  { %s97_s16 = smov 128   ;;  %s98_s17 = smov 8  }
  0x11   :  { %19 = dma.hbm_to_vmem [thread:$0]  %s134_s0, 256, %s14_s7, [#allocation3], %s97_s16, %s97_s16, %s98_s17  }
  0x12   :  { %92 = dma.done.wait [#allocation3], 256  }
  0x13   :  { %93 = vsyncadd [#allocation3], 4294967040  ;;  %s99_s20 = smov [#allocation5]   ;;  %v23_v0 = vld [vmem:[#allocation2] sm:$0xff]  ;;  %v24_v1 = vld [vmem:[#allocation2 + $0x8] sm:$0xff] }
  0x14   :  { %s32_s21 = sshll.u32 %s99_s20, 4  ;;  %25 = vst [vmem:[#allocation5] sm:$0xff] %v23_v0  ;;  %26 = vst [vmem:[#allocation5 + $0x8] sm:$0xff] %v24_v1  ;;  %s33_s21 = int_to_ptr.vmem [resolvable:$true] %s32_s21 }
  0x15   :  { %s70_s22 = scalar_lea.vmem %s33_s21, 256  ;;  %p75_p9 = scmp.lt.s32.totalorder %s33_s21, %s33_s21 }
  0x16   :  { %p71_p8 = scmp.ne.s32.totalorder %s33_s21, %s70_s22  ;;  %p76_p10 = scmp.lt.s32.totalorder %s70_s22, %s70_s22 }
  0x18   :  { %p77_p11 = por %p76_p10, %p75_p9 }
  0x1a   :  { %p78_p12 = pnand %p77_p11, %p71_p8 }
  0x1c   :  { %81 = shalt.err (!%p78_p12)
}
  0x1d   :  { %s82_s0 = scalar_lea.hbm %s135_s1, 256 }
  0x1e   :  { %p83_p13 = scmp.ne.s32.totalorder %s135_s1, %s82_s0  ;;  %p86_p0 = scmp.lt.u32.totalorder %s82_s0, %s135_s1 }
  0x20   :  { %p88_p1 = pnand %p86_p0, %p83_p13 }
  0x22   :  { %91 = shalt.err (!%p88_p1)
}
  0x23   :  { %38 = dma.vmem_to_hbm [thread:$0]  %s33_s21, 256, %s135_s1, [#allocation4], %s97_s16, %s97_s16, %s98_s17  }
  0x24   :  { %94 = dma.done.wait [#allocation4], 256  }
  0x25   :  { %95 = vsyncadd [#allocation4], 4294967040 }
  0x26   :  { %42 = vsyncpa [#allocation3], 1 }
  0x27   :  { %43 = vsyncpa [#allocation4], 1 }

</bundles_post_ra>
